<compile_context>
chip_gen: v7x
topology: tpu7x:2x2x1
jax: 0.10.0
libtpu: 0.0.40
codegen_flags: <defaults>
</compile_context>

<pallas_src>
import jax
import jax.numpy as jnp
from jax.experimental import pallas as pl
from jax.experimental.pallas import tpu as pltpu


def _nconv_kernel(at_ref, x_ref, o_ref):
    # at_ref: (W, V)  resident across the grid
    # x_ref : (V, TM) lane-dense tile of the flattened (n, c, l) axis
    # o_ref : (W, TM)
    o_ref[...] = jnp.dot(
        at_ref[...], x_ref[...], preferred_element_type=jnp.float32
    ).astype(o_ref.dtype)


def nconv(x, A, *, tile_m=512):
    """x: (N, C, V, L), A: (V, W) -> (N, C, W, L).
    Same semantics as torch.einsum('ncvl,vw->ncwl', (x, A))."""
    n, c, v, l = x.shape
    v2, w = A.shape
    assert v == v2, (v, v2)

    m = n * c * l
    # Lane-dense restructure: contraction axis first, everything else fused
    # into the lane (last) axis.
    x2 = jnp.transpose(x, (2, 0, 1, 3)).reshape(v, m)   # (V, N*C*L)
    at = jnp.transpose(A)                                # (W, V) hoisted A^T

    # Pick a 128-aligned lane tile.
    tm = min(int(tile_m), pl.cdiv(m, 128) * 128)
    if pl.cdiv(m, tm) == 1 and tm > 128:
        # Keep >= 2 grid steps when possible so v7x's two TensorCores both
        # get work on the "parallel" axis.
        tm = max(128, pl.cdiv(m, 2 * 128) * 128)
    m_pad = pl.cdiv(m, tm) * tm
    if m_pad != m:
        x2 = jnp.pad(x2, ((0, 0), (0, m_pad - m)))

    grid = (m_pad // tm,)

    out2 = pl.pallas_call(
        _nconv_kernel,
        out_shape=jax.ShapeDtypeStruct((w, m_pad), x.dtype),
        grid_spec=pltpu.PrefetchScalarGridSpec(
            num_scalar_prefetch=0,
            grid=grid,
            in_specs=[
                # A^T: constant index_map -> DMA'd once, stays VMEM-resident.
                pl.BlockSpec((w, v), lambda i: (0, 0)),
                # x: one lane-dense (V, TM) tile per step.
                pl.BlockSpec((v, tm), lambda i: (0, i)),
            ],
            out_specs=pl.BlockSpec((w, tm), lambda i: (0, i)),
        ),
        compiler_params=pltpu.CompilerParams(
            dimension_semantics=("parallel",),
            vmem_limit_bytes=32 * 1024 * 1024,
        ),
    )(at, x2)

    out2 = out2[:, :m]                                   # drop lane padding
    return out2.reshape(w, n, c, l).transpose(1, 2, 0, 3)  # -> (N, C, W, L)


if __name__ == "__main__":
    key = jax.random.PRNGKey(0)
    kx, ka = jax.random.split(key)
    N, C, V, W, L = 2, 4, 16, 16, 16
    x = jax.random.normal(kx, (N, C, V, L), dtype=jnp.float32)
    A = jax.random.normal(ka, (V, W), dtype=jnp.float32)

    out = jax.block_until_ready(nconv(x, A))

    # Reference check against plain JAX einsum (same semantics as the torch module).
    ref = jnp.einsum('ncvl,vw->ncwl', x, A)
    assert out.shape == (N, C, W, L)
    assert jnp.allclose(out, ref, atol=1e-3, rtol=1e-3)

    print("KERNEL_OK")
</pallas_src>

<mosaic_0001>
module attributes {stable_mosaic.version = 11 : i64} {
  func.func @_nconv_kernel(%arg0: i32, %arg1: memref<16x16xf32, #tpu.memory_space<vmem>>, %arg2: memref<16x128xf32, #tpu.memory_space<vmem>>, %arg3: memref<16x128xf32, #tpu.memory_space<vmem>>) attributes {dimension_semantics = [#tpu.dimension_semantics<parallel>], iteration_bounds = array<i64: 1>, scalar_prefetch = 0 : i64, scratch_operands = 0 : i64, tpu.core_type = #tpu.core_type<tc>, window_params = [{pipeline_mode = #tpu.pipeline_mode<synchronous>, transform_indices = @transform_0, window_bounds = array<i64: 16, 16>}, {transform_indices = @transform_1, window_bounds = array<i64: 16, 128>}, {transform_indices = @transform_2, window_bounds = array<i64: 16, 128>}]} {
    %c0 = arith.constant 0 : index
    %c0_0 = arith.constant 0 : index
    %0 = vector.load %arg1[%c0, %c0_0] : memref<16x16xf32, #tpu.memory_space<vmem>>, vector<16x16xf32>
    %c0_1 = arith.constant 0 : index
    %c0_2 = arith.constant 0 : index
    %1 = vector.load %arg2[%c0_1, %c0_2] : memref<16x128xf32, #tpu.memory_space<vmem>>, vector<16x128xf32>
    %cst = arith.constant dense<0.000000e+00> : vector<16x128xf32>
    %2 = tpu.matmul %0, %1, %cst {dimension_numbers = #tpu.dot_dimension_numbers<[1], [0], [0], [1], [0, 0, 1, 1], [], []>} : vector<16x16xf32>, vector<16x128xf32>, vector<16x128xf32> -> vector<16x128xf32>
    %c0_3 = arith.constant 0 : index
    %c0_4 = arith.constant 0 : index
    %3 = vector.load %arg3[%c0_3, %c0_4] : memref<16x128xf32, #tpu.memory_space<vmem>>, vector<16x128xf32>
    tpu.vector_store %arg3[%c0_3, %c0_4], %2 {strides = array<i32>} : memref<16x128xf32, #tpu.memory_space<vmem>>, vector<16x128xf32>,
    return
  }
  func.func @transform_0(%arg0: i32) -> (i32, i32) {
    %c0_i32 = arith.constant 0 : i32
    %c0_i32_0 = arith.constant 0 : i32
    %c0_i32_1 = arith.constant 0 : i32
    return %c0_i32, %c0_i32_0 : i32, i32
  }
  func.func @transform_1(%arg0: i32) -> (i32, i32) {
    %c0_i32 = arith.constant 0 : i32
    %c0_i32_0 = arith.constant 0 : i32
    return %c0_i32, %arg0 : i32, i32
  }
  func.func @transform_2(%arg0: i32) -> (i32, i32) {
    %c0_i32 = arith.constant 0 : i32
    %c0_i32_0 = arith.constant 0 : i32
    return %c0_i32, %arg0 : i32, i32
  }
}

</mosaic_0001>

<bundles_post_ra>
// kernel: tpu_custom_call.1
= control target key start
LH: loop header
LB: loop body
LE: loop exit
PB: predicated region body
PF: predicated region fallthrough
CT: control target
= control target key end

     0   :  { %7 = vsyncpa [#allocation3], 0  ;;  %s305_s0 = inlined_call_operand.hbm [shape: f32[16,16], index: 0, kind: input, shape index: {}]   ;;  %s306_s1 = inlined_call_operand.hbm [shape: f32[16,128], index: 1, kind: input, shape index: {}]   ;;  %s307_s2 = inlined_call_operand.hbm [shape: f32[16,128], index: 2, kind: output, shape index: {}]  }
   0x1   :  { %8 = vsyncpa [#allocation6], 0 }
   0x2   :  { %9 = vsyncpa [#allocation4], 0  ;;  %s240_s9 = smov [#allocation2]   ;;  %s168_s13 = scalar_lea.hbm %s305_s0, 256 }
   0x3   :  { %s15_s10 = sshll.u32 %s240_s9, 4  ;;  %p169_p0 = scmp.ne.s32.totalorder %s305_s0, %s168_s13  ;;  %s16_s10 = int_to_ptr.vmem [resolvable:$true] %s15_s10 }
   0x4   :  { %p172_p1 = scmp.lt.u32.totalorder %s168_s13, %s305_s0 }
   0x6   :  { %p174_p2 = pnand %p172_p1, %p169_p0 }
   0x8   :  { %177 = shalt.err (!%p174_p2)
}
   0x9   :  { %s178_s18 = scalar_lea.vmem %s16_s10, 256  ;;  %p183_p4 = scmp.lt.s32.totalorder %s16_s10, %s16_s10 }
   0xa   :  { %p179_p3 = scmp.ne.s32.totalorder %s16_s10, %s178_s18  ;;  %p184_p5 = scmp.lt.s32.totalorder %s178_s18, %s178_s18 }
   0xc   :  { %p185_p6 = por %p184_p5, %p183_p4 }
   0xe   :  { %p186_p7 = pnand %p185_p6, %p179_p3 }
  0x10   :  { %189 = shalt.err (!%p186_p7)
}
  0x11   :  { %s241_s19 = smov 128   ;;  %s242_s20 = smov 8  }
  0x12   :  { %21 = dma.hbm_to_vmem [thread:$0]  %s305_s0, 256, %s16_s10, [#allocation3], %s241_s19, %s241_s19, %s242_s20  }
  0x13   :  { %s243_s23 = smov [#allocation5]   ;;  %s190_s27 = scalar_lea.hbm %s306_s1, 256 }
  0x14   :  { %s27_s24 = sshll.u32 %s243_s23, 4  ;;  %p191_p8 = scmp.ne.s32.totalorder %s306_s1, %s190_s27  ;;  %s28_s24 = int_to_ptr.vmem [resolvable:$true] %s27_s24 }
  0x15   :  { %p194_p9 = scmp.lt.u32.totalorder %s190_s27, %s306_s1 }
  0x17   :  { %p196_p10 = pnand %p194_p9, %p191_p8 }
  0x19   :  { %199 = shalt.err (!%p196_p10)
}
  0x1a   :  { %s200_s4 = scalar_lea.vmem %s28_s24, 256  ;;  %p205_p12 = scmp.lt.s32.totalorder %s28_s24, %s28_s24 }
  0x1b   :  { %p201_p11 = scmp.ne.s32.totalorder %s28_s24, %s200_s4  ;;  %p206_p13 = scmp.lt.s32.totalorder %s200_s4, %s200_s4 }
  0x1d   :  { %p207_p0 = por %p206_p13, %p205_p12 }
  0x1f   :  { %p208_p1 = pnand %p207_p0, %p201_p11 }
  0x21   :  { %211 = shalt.err (!%p208_p1)
}
  0x22   :  { %33 = dma.hbm_to_vmem [thread:$0]  %s306_s1, 256, %s28_s24, [#allocation6], %s241_s19, %s241_s19, %s242_s20  }
  0x23   :  { %234 = dma.done.wait [#allocation3], 256  }
  0x24   :  { %235 = vsyncadd [#allocation3], 4294967040 }
  0x25   :  { %236 = dma.done.wait [#allocation6], 256  }
  0x26   :  { %237 = vsyncadd [#allocation6], 4294967040  ;;  %vm44_vm0 = vcmask 130048   ;;  %v42_v0 = vld [vmem:[#allocation5] sm:$0xff]  ;;  %v43_v1 = vld [vmem:[#allocation5 + $0x8] sm:$0xff]  ;;  %s244_s6 = smov [#allocation7]  }
  0x27   :  { %v40_v2 = vld [vmem:[#allocation2] sm:$0xff]  ;;  %v159_v3 = vpack.c.bf16 %v43_v1, %v42_v0  ;;  %v41_v4 = vld [vmem:[#allocation2 + $0x8] sm:$0xff]  ;;  %s133_s7 = sshll.u32 %s244_s6, 4  ;;  %s134_s7 = int_to_ptr.vmem [resolvable:$true] %s133_s7 }
  0x28   :  { %156 = vmatprep.mubr.msk.f32.mxu0 %vm44_vm0, %v40_v2  ;;  %s212_s1 = scalar_lea.vmem %s134_s7, 256  ;;  %p217_p3 = scmp.lt.s32.totalorder %s134_s7, %s134_s7 }
  0x29   :  { %160 = vmatprep.subr.bf16.mxu0 %v159_v3  ;;  %p213_p2 = scmp.ne.s32.totalorder %s134_s7, %s212_s1  ;;  %p218_p4 = scmp.lt.s32.totalorder %s212_s1, %s212_s1 }
  0x2a   :  { %162 = vmatpush3.bf16.msra.mxu0 %v159_v3 }
  0x2b   :  { %p219_p5 = por %p218_p4, %p217_p3 }
  0x2d   :  { %157 = vmatmul.mubr.msk.f32.vlgmr.msra.gmra.mrb[0].mxu0 %vm44_vm0, %v41_v4  ;;  %p220_p6 = pnand %p219_p5, %p213_p2 }
 0x100   :  { %v158_v5 = vpop.f32.mrb[0].mxu0 }
 0x101   :  { %127 = vst [vmem:[#allocation7 + $0x8] sm:$0xff] %v158_v5  ;;  %v117_v6 = vpop.f32.mrb[1].mxu0 }
 0x102   :  { %126 = vst [vmem:[#allocation7] sm:$0xff] %v117_v6 }
 0x103   :  { %223 = shalt.err (!%p220_p6)
}
 0x104   :  { %s224_s10 = scalar_lea.hbm %s307_s2, 256 }
 0x105   :  { %p225_p7 = scmp.ne.s32.totalorder %s307_s2, %s224_s10  ;;  %p228_p8 = scmp.lt.u32.totalorder %s224_s10, %s307_s2 }
 0x107   :  { %p230_p9 = pnand %p228_p8, %p225_p7 }
 0x109   :  { %233 = shalt.err (!%p230_p9)
}
 0x10a   :  { %139 = dma.vmem_to_hbm [thread:$0]  %s134_s7, 256, %s307_s2, [#allocation4], %s241_s19, %s241_s19, %s242_s20  }
 0x10b   :  { %238 = dma.done.wait [#allocation4], 256  }
 0x10c   :  { %239 = vsyncadd [#allocation4], 4294967040 }
 0x10d   :  { %143 = vsyncpa [#allocation3], 1 }
 0x10e   :  { %144 = vsyncpa [#allocation6], 1 }
 0x10f   :  { %145 = vsyncpa [#allocation4], 1 }

</bundles_post_ra>
